<compile_context>
chip_gen: v6e
topology: v6e:2x2x1
jax: 0.10.0
libtpu: 0.0.40
codegen_flags: <defaults>
</compile_context>

<pallas_src>
import functools

import jax
import jax.numpy as jnp
from jax import lax
from jax.experimental import pallas as pl
from jax.experimental.pallas import tpu as pltpu

_SUBLANES = 8
_LANES = 128


def _round_up(x, m):
    return ((x + m - 1) // m) * m


def _ce_label_smooth_kernel(logits_ref, target_ref, out_ref, *, epsilon,
                            num_classes, n_rows, block_rows, mask_rows,
                            use_mxu_sum):
    i = pl.program_id(0)

    x_nat = logits_ref[...]                  # (TN, C) native dtype
    tgt = target_ref[...]                    # (TN, 1) int32

    # Row max and the target-logit pick stay in the native dtype (max and a
    # single-element select/sum are exact in bf16); only their (TN, 1) results
    # are upcast.  The only full-width f32 work is the subtract+exp pass.
    m = jnp.max(x_nat, axis=1, keepdims=True).astype(jnp.float32)        # (TN,1)
    col_ids = lax.broadcasted_iota(jnp.int32, x_nat.shape, 1)
    picked = jnp.sum(
        jnp.where(col_ids == tgt, x_nat, jnp.zeros_like(x_nat)),
        axis=1, keepdims=True).astype(jnp.float32)                        # (TN,1)

    if use_mxu_sum:
        # Row-sum for the uniform smoothing term on the (otherwise idle) MXU
        # instead of another VALU reduce pass over the tile.
        ones = jnp.ones((num_classes, _LANES), dtype=x_nat.dtype)
        sum_x = jnp.dot(x_nat, ones,
                        preferred_element_type=jnp.float32)[:, :1]        # (TN,1)
    else:
        sum_x = jnp.sum(x_nat.astype(jnp.float32), axis=1, keepdims=True)

    shifted = x_nat.astype(jnp.float32) - m                               # (TN,C)
    lse = jnp.log(jnp.sum(jnp.exp(shifted), axis=1, keepdims=True))       # (TN,1)

    # loss_row = -sum_c [(1-eps)*onehot_c + eps/C] * (x_c - m - lse)
    per_row = (-(1.0 - epsilon) * (picked - m - lse)
               - (epsilon / num_classes) * (sum_x - num_classes * (m + lse)))

    if mask_rows:
        # Ragged last tile: OOB rows hold undefined bytes, but any NaN/Inf they
        # produce is confined to their own row, so this cheap (TN, 1) mask on
        # the per-row loss is sufficient (no full-width pre-mask of x).
        row_ids = i * block_rows + lax.broadcasted_iota(
            jnp.int32, (block_rows, 1), 0)
        per_row = jnp.where(row_ids < n_rows, per_row, 0.0)

    tile_sum = jnp.sum(per_row)
    # Lane-dense partial-sum slab: one unmasked vreg store; keeps the batch
    # grid axis "parallel" (no serialized accumulator).
    out_ref[...] = jnp.full((1, _SUBLANES, _LANES), tile_sum, dtype=jnp.float32)


def _vmem_budget_bytes():
    # Chip-aware scoped-VMEM budget: ~60% of physical VMEM, capped at 100 MiB.
    # v5e/v6e (128 MiB) -> ~76 MiB; v7x (64 MiB) -> ~38 MiB.  Fall back to the
    # v7x-safe number if the hardware query is unavailable.
    cap = None
    try:
        cap = getattr(pltpu.get_tpu_info(), "vmem_capacity_bytes", None)
    except Exception:
        cap = None
    if not cap:
        cap = 64 * 1024 * 1024
    return min(int(cap * 0.6), 100 * 1024 * 1024)


def _pick_block_rows(n, c, native_bytes, vmem_budget, use_mxu_sum):
    if n <= _SUBLANES:
        return n                      # single full block (== array dims is legal)
    c_pad = _round_up(c, _LANES)
    # Per-row VMEM estimate:
    #   2x double-buffered native logits tile + ~1 native-width temp,
    #   ~3 full-width f32 temporaries (upcast / shifted / exp),
    #   lane-padded (TN, 1) int32 target block, double-buffered.
    per_row = (3 * c_pad * native_bytes
               + 3 * c_pad * 4
               + 2 * _LANES * 4)
    fixed = 2 * _SUBLANES * _LANES * 4          # double-buffered output slab
    if use_mxu_sum:
        fixed += c_pad * _LANES * native_bytes  # in-kernel ones constant
    sizing_budget = int(vmem_budget * 0.75)     # headroom for compiler scratch
    rows = max(_SUBLANES, (sizing_budget - fixed) // per_row)
    rows = min(rows, 8192)
    # Guarantee >= 2 grid steps so the "parallel" batch axis can shard across
    # both v7x TensorCores (neutral on single-TC v5e/v6e).
    rows = min(rows, _round_up(pl.cdiv(n, 2), _SUBLANES))
    rows = max(_SUBLANES, (rows // _SUBLANES) * _SUBLANES)
    return rows


def cross_entropy_label_smooth(logits, target, *, num_classes, epsilon,
                               reduction="mean", block_rows=None):
    """logits: (N, C) float (any dtype); target: (N,) int. Returns scalar f32 loss."""
    n, c = logits.shape
    assert c == num_classes
    target2d = target.astype(jnp.int32).reshape(n, 1)

    native_bytes = jnp.dtype(logits.dtype).itemsize
    # MXU row-sum offload only when C is lane-wide and the ones constant stays
    # small; otherwise a VALU reduce is used.
    use_mxu_sum = (c >= _LANES) and (c * _LANES * native_bytes <= 8 * 1024 * 1024)

    vmem_budget = _vmem_budget_bytes()

    if block_rows is not None:
        tn = int(block_rows)
        if tn >= n:
            tn = n
        else:
            tn = max(_SUBLANES, (tn // _SUBLANES) * _SUBLANES)  # (8,128) rule
        tn = min(tn, n) if n <= _SUBLANES else tn
    else:
        tn = _pick_block_rows(n, c, native_bytes, vmem_budget, use_mxu_sum)
    tn = min(int(tn), n) if n <= _SUBLANES else int(tn)

    num_tiles = pl.cdiv(n, tn)
    mask_rows = (n % tn) != 0

    kernel = functools.partial(
        _ce_label_smooth_kernel,
        epsilon=float(epsilon),
        num_classes=int(num_classes),
        n_rows=int(n),
        block_rows=int(tn),
        mask_rows=bool(mask_rows),
        use_mxu_sum=bool(use_mxu_sum),
    )

    partials = pl.pallas_call(
        kernel,
        out_shape=jax.ShapeDtypeStruct((num_tiles, _SUBLANES, _LANES),
                                       jnp.float32),
        grid_spec=pltpu.PrefetchScalarGridSpec(
            num_scalar_prefetch=0,
            grid=(num_tiles,),
            in_specs=[
                pl.BlockSpec((tn, c), lambda i: (i, 0)),   # logits, native dtype
                pl.BlockSpec((tn, 1), lambda i: (i, 0)),   # target indices
            ],
            out_specs=pl.BlockSpec((1, _SUBLANES, _LANES), lambda i: (i, 0, 0)),
        ),
        compiler_params=pltpu.CompilerParams(
            dimension_semantics=("parallel",),
            vmem_limit_bytes=int(vmem_budget)),
    )(logits, target2d)

    total = jnp.sum(partials[:, 0, 0])          # tiny (num_tiles,) reduction
    if reduction in ("avg", "mean"):
        return total / jnp.float32(n)
    if reduction == "sum":
        return total
    # TODO(synk): PyTorch returns the unreduced (N, C) loss for other values of
    # `reduction`; only the scalar reductions are implemented here.
    raise NotImplementedError(f"reduction={reduction!r} is not supported")


def _reference(logits, target, num_classes, epsilon, reduction="mean"):
    log_probs = jax.nn.log_softmax(logits.astype(jnp.float32), axis=1)
    one_hot = jax.nn.one_hot(target, num_classes, dtype=jnp.float32)
    if epsilon > 0.0:
        targets = (1.0 - epsilon) * one_hot + epsilon / num_classes
    else:
        targets = one_hot
    per_row = jnp.sum(-targets * log_probs, axis=1)
    if reduction in ("avg", "mean"):
        return jnp.mean(per_row)
    return jnp.sum(per_row)


if __name__ == "__main__":
    key = jax.random.PRNGKey(0)
    k1, k2, k3, k4, k5, k6 = jax.random.split(key, 6)

    # Test 1: small C (VALU reduce path), even split into >=2 tiles, f32 logits.
    n1, c1, eps = 32, 16, 0.1
    logits1 = jax.random.normal(k1, (n1, c1), dtype=jnp.float32)
    target1 = jax.random.randint(k2, (n1,), 0, c1, dtype=jnp.int32)
    for red in ("mean", "sum"):
        got = jax.block_until_ready(cross_entropy_label_smooth(
            logits1, target1, num_classes=c1, epsilon=eps, reduction=red))
        ref = _reference(logits1, target1, c1, eps, red)
        assert jnp.allclose(got, ref, atol=1e-5, rtol=1e-5), (red, got, ref)

    # Test 2: ragged batch tiling (N % TN != 0) with bf16 logits entering the
    # kernel in native dtype (exercises the per-row mask and native-dtype
    # max/pick with f32 exp-sum).
    n2, c2 = 20, 32
    logits2 = jax.random.normal(k3, (n2, c2), dtype=jnp.float32).astype(
        jnp.bfloat16)
    target2 = jax.random.randint(k4, (n2,), 0, c2, dtype=jnp.int32)
    got2 = jax.block_until_ready(cross_entropy_label_smooth(
        logits2, target2, num_classes=c2, epsilon=0.1, reduction="mean",
        block_rows=8))
    ref2 = _reference(logits2, target2, c2, 0.1, "mean")
    assert jnp.allclose(got2, ref2, atol=1e-4, rtol=1e-4), (got2, ref2)

    # Test 3: C >= 128 -> MXU row-sum path, auto tile choice, f32 logits.
    n3, c3 = 64, 256
    logits3 = jax.random.normal(k5, (n3, c3), dtype=jnp.float32)
    target3 = jax.random.randint(k6, (n3,), 0, c3, dtype=jnp.int32)
    got3 = jax.block_until_ready(cross_entropy_label_smooth(
        logits3, target3, num_classes=c3, epsilon=0.1, reduction="mean"))
    ref3 = _reference(logits3, target3, c3, 0.1, "mean")
    assert jnp.allclose(got3, ref3, atol=1e-4, rtol=1e-4), (got3, ref3)

    print("KERNEL_OK")
</pallas_src>

<mosaic_0001>
module attributes {stable_mosaic.version = 11 : i64} {
  func.func @_ce_label_smooth_kernel(%arg0: i32, %arg1: memref<16x16xf32, #tpu.memory_space<vmem>>, %arg2: memref<16x1xi32, #tpu.memory_space<vmem>>, %arg3: memref<1x8x128xf32, #tpu.memory_space<vmem>>) attributes {dimension_semantics = [#tpu.dimension_semantics<parallel>], iteration_bounds = array<i64: 2>, scalar_prefetch = 0 : i64, scratch_operands = 0 : i64, tpu.core_type = #tpu.core_type<tc>, window_params = [{transform_indices = @transform_0, window_bounds = array<i64: 16, 16>}, {transform_indices = @transform_1, window_bounds = array<i64: 16, 1>}, {transform_indices = @transform_2, window_bounds = array<i64: 1, 8, 128>}]} {
    %c0 = arith.constant 0 : index
    %c0_0 = arith.constant 0 : index
    %0 = vector.load %arg1[%c0, %c0_0] : memref<16x16xf32, #tpu.memory_space<vmem>>, vector<16x16xf32>
    %c0_1 = arith.constant 0 : index
    %c0_2 = arith.constant 0 : index
    %1 = vector.load %arg2[%c0_1, %c0_2] : memref<16x1xi32, #tpu.memory_space<vmem>>, vector<16x1xi32>
    %cst = arith.constant dense<0xFF800000> : vector<16xf32>
    %2 = vector.multi_reduction <maximumf>, %0, %cst [1] : vector<16x16xf32> to vector<16xf32>
    %3 = vector.shape_cast %2 : vector<16xf32> to vector<16x1xf32>
    %4 = tpu.iota {dimensions = array<i32: 1>} : vector<16x16xi32>
    %5 = vector.broadcast %1 : vector<16x1xi32> to vector<16x16xi32>
    %6 = arith.cmpi eq, %4, %5 : vector<16x16xi32>
    %cst_3 = arith.constant 0.000000e+00 : f32
    %7 = vector.broadcast %cst_3 : f32 to vector<16x16xf32>
    %8 = arith.select %6, %0, %7 : vector<16x16xi1>, vector<16x16xf32>
    %cst_4 = arith.constant dense<0.000000e+00> : vector<16xf32>
    %9 = vector.multi_reduction <add>, %8, %cst_4 [1] : vector<16x16xf32> to vector<16xf32>
    %10 = vector.shape_cast %9 : vector<16xf32> to vector<16x1xf32>
    %cst_5 = arith.constant dense<0.000000e+00> : vector<16xf32>
    %11 = vector.multi_reduction <add>, %0, %cst_5 [1] : vector<16x16xf32> to vector<16xf32>
    %12 = vector.shape_cast %11 : vector<16xf32> to vector<16x1xf32>
    %13 = vector.broadcast %3 : vector<16x1xf32> to vector<16x16xf32>
    %14 = arith.subf %0, %13 : vector<16x16xf32>
    %15 = math.exp %14 : vector<16x16xf32>
    %cst_6 = arith.constant dense<0.000000e+00> : vector<16xf32>
    %16 = vector.multi_reduction <add>, %15, %cst_6 [1] : vector<16x16xf32> to vector<16xf32>
    %17 = vector.shape_cast %16 : vector<16xf32> to vector<16x1xf32>
    %18 = math.log %17 : vector<16x1xf32>
    %19 = arith.subf %10, %3 : vector<16x1xf32>
    %20 = arith.subf %19, %18 : vector<16x1xf32>
    %cst_7 = arith.constant -0.899999976 : f32
    %21 = vector.broadcast %cst_7 : f32 to vector<16x1xf32>
    %22 = arith.mulf %21, %20 : vector<16x1xf32>
    %23 = arith.addf %3, %18 : vector<16x1xf32>
    %cst_8 = arith.constant 1.600000e+01 : f32
    %24 = vector.broadcast %cst_8 : f32 to vector<16x1xf32>
    %25 = arith.mulf %24, %23 : vector<16x1xf32>
    %26 = arith.subf %12, %25 : vector<16x1xf32>
    %cst_9 = arith.constant 6.250000e-03 : f32
    %27 = vector.broadcast %cst_9 : f32 to vector<16x1xf32>
    %28 = arith.mulf %27, %26 : vector<16x1xf32>
    %29 = arith.subf %22, %28 : vector<16x1xf32>
    %30 = vector.shape_cast %29 : vector<16x1xf32> to vector<1x16x1xf32>
    %cst_10 = arith.constant dense<0.000000e+00> : vector<1xf32>
    %31 = vector.multi_reduction <add>, %30, %cst_10 [1, 2] : vector<1x16x1xf32> to vector<1xf32>
    %32 = vector.shape_cast %31 : vector<1xf32> to vector<1x1x1xf32>
    %33 = vector.extract %32[0, 0, 0] : f32 from vector<1x1x1xf32>
    %34 = vector.broadcast %33 : f32 to vector<1x8x128xf32>
    %c0_11 = arith.constant 0 : index
    %c0_12 = arith.constant 0 : index
    %c0_13 = arith.constant 0 : index
    %35 = vector.load %arg3[%c0_11, %c0_12, %c0_13] : memref<1x8x128xf32, #tpu.memory_space<vmem>>, vector<1x8x128xf32>
    tpu.vector_store %arg3[%c0_11, %c0_12, %c0_13], %34 {strides = array<i32>} : memref<1x8x128xf32, #tpu.memory_space<vmem>>, vector<1x8x128xf32>,
    return
  }
  func.func @transform_0(%arg0: i32) -> (i32, i32) {
    %c0_i32 = arith.constant 0 : i32
    %c0_i32_0 = arith.constant 0 : i32
    return %arg0, %c0_i32 : i32, i32
  }
  func.func @transform_1(%arg0: i32) -> (i32, i32) {
    %c0_i32 = arith.constant 0 : i32
    %c0_i32_0 = arith.constant 0 : i32
    return %arg0, %c0_i32 : i32, i32
  }
  func.func @transform_2(%arg0: i32) -> (i32, i32, i32) {
    %c0_i32 = arith.constant 0 : i32
    %c0_i32_0 = arith.constant 0 : i32
    %c0_i32_1 = arith.constant 0 : i32
    return %arg0, %c0_i32, %c0_i32_0 : i32, i32, i32
  }
}

</mosaic_0001>

<bundles_post_ra>
// kernel: tpu_custom_call.1
= control target key start
LH: loop header
LB: loop body
LE: loop exit
PB: predicated region body
PF: predicated region fallthrough
CT: control target
= control target key end

     0   :  { %7 = vsyncpa [#allocation3], 0  ;;  %s580_s0 = inlined_call_operand.vmem [shape: f32[32,16], index: 0, kind: input, shape index: {}]   ;;  %s581_s1 = inlined_call_operand.vmem [shape: s32[32,1], index: 1, kind: input, shape index: {}]   ;;  %s582_s2 = inlined_call_operand.hbm [shape: f32[2,8,128], index: 2, kind: output, shape index: {}]  }
   0x1   :  { %9 = vsyncpa [#allocation3 + $0x1], 0  ;;  %s477_s9 = smov 0   ;;  %s479_s10 = smov 0  }
   0x2   :  { %s481_s11 = smov 0   ;;  %s483_s12 = smov 0  }
   0x3 LB: > { %s498_s13 = sadd.s32 4294967295, %s458_s12   ;;  %s333_s14 = sadd.s32 4294967294, %s458_s12   ;;  %s458_s12 = sphi %s483_s12, %s588_s12   ;;  %s454_s11 = sphi %s481_s11, %s587_s11   ;;  %s450_s10 = sphi %s479_s10, %s586_s10   ;;  %s446_s9 = sphi %s477_s9, %s585_s9  }
   0x4   : > { %s502_s15 = sadd.s32 1, %s458_s12   ;;  %s74_s16 = sadd.s32 1, %s454_s11 }
   0x5   : > { %s71_s17 = ssub.s32 %s458_s12, %s502_s15  ;;  %p84_p0 = scmp.ne.s32.totalorder %s454_s11, %s450_s10 }
   0x6   : > { %p72_p1 = scmp.eq.s32.totalorder %s71_s17, 0  ;;  %p85_p2 = scmp.eq.s32.totalorder %s498_s13, 1 }
   0x7   : > { %p90_p3 = scmp.ne.s32.totalorder %s450_s10, %s446_s9  ;;  %p91_p4 = scmp.eq.s32.totalorder %s333_s14, 1 }
   0x8   : > { %s513_s18 = scalar_select %p72_p1, %s454_s11, %s74_s16  }
   0x9   : > { %p515_p5 = por %p85_p2, %p84_p0  ;;  %p519_p6 = por %p91_p4, %p90_p3 }
   0xa   : > { %p336_p7 = scmp.ge.s32.totalorder %s458_s12, 1  ;;  %p127_p8 = scmp.lt.s32.totalorder %s458_s12, 3 }
   0xc   : > { %p128_p9 = pnand %p336_p7, %p127_p8 }
   0xd   : > { %s338_s21 = sshll.u32 (!%p128_p9), %s498_s13, 1  ;;  %s151_s29 = sand.u32 (!%p128_p9), 1, %s450_s10  }
   0xe   : > { %131 = sbr.rel (%p128_p9) target bundleno = 566 (0x236), region = 28  ;;  %p155_p10 = scmp.lt.s32.totalorder (!%p128_p9), %s338_s21, 3 }
   0xf   : > { %s337_s30 = sshll.u32 (!%p128_p9), %s151_s29, 3  ;;  %s343_s5 = sshll.u32 (!%p128_p9), %s498_s13, 7 }
  0x10   : > { %s153_s3 = scalar_lea.vmem (!%p128_p9), [#allocation2], %s337_s30  ;;  %s260_s14 = scalar_lea.hbm (!%p128_p9), %s582_s2, %s343_s5 }
  0x11   : > { %s262_s4 = sshll.u32 (!%p128_p9), %s153_s3, 4  ;;  %s249_s16 = scalar_lea.sflag (!%p128_p9), [#allocation3], %s151_s29  ;;  %s542_s4 = int_to_ptr.vmem [resolvable:$true] %s262_s4 }
  0x12   : > { %s398_s17 = scalar_lea.vmem (!%p128_p9), %s542_s4, 128 }
  0x13   : > { %v460_v0 = vmov 0   ;;  %s590_s21 = smov (!%p155_p10, %s338_s21), 3  ;;  %vm170_vm0 = vcmask 130048   ;;  %v177_v13 = vlaneseq  ;;  %vm233_vm3 = vcmask 7168   ;;  %p399_p11 = scmp.ne.s32.totalorder %s542_s4, %s398_s17 }
  0x14   : > { %388 = vset.pattern.permute.xlu1 %v460_v0  ;;  %389 = vset.pattern.permute.xlu0 %v460_v0  ;;  %s339_s22 = sshll.u32 %s590_s21, 3  ;;  %s461_s21 = smov [#allocation2]  }
  0x15   : > { %s158_s25 = scalar_lea.vmem %s580_s0, %s339_s22  ;;  %s164_s28 = scalar_lea.vmem %s581_s1, %s339_s22  ;;  %v178_v15 = vand.u32 127, %v177_v13 }
  0x16   : > { %v166_v1 = vld [vmem:[%s158_s25] sm:$0xff]  ;;  %v167_v2 = vld [vmem:[%s158_s25 + $0x8] sm:$0xff]  ;;  %p400_p12 = pnand %p399_p11, %p515_p5  ;;  %s402_s13 = sshll.u32 %s461_s21, 4  ;;  %s403_s13 = int_to_ptr.vmem [resolvable:$false] %s402_s13 }
  0x17   : > { %v168_v3 = vld [vmem:[%s164_s28] sm:$0xff]  ;;  %v171_v4 = vsel %vm170_vm0, %v166_v1, -inf  ;;  %v169_v5 = vld [vmem:[%s164_s28 + $0x8] sm:$0xff]  ;;  %v174_v6 = vsel %vm170_vm0, %v167_v2, -inf  ;;  %v195_v25 = vsel %vm170_vm0, %v166_v1, 0.0  ;;  %v198_v26 = vsel %vm170_vm0, %v167_v2, 0.0  ;;  %p405_p0 = scmp.lt.s32.totalorder %s542_s4, %s403_s13 }
  0x18   : > { %180 = vperm.xlu1 %388, %v168_v3   ;;  %172 = vmax.xlane.f32.xlu0 %v171_v4  ;;  %p401_p13 = pneg %p400_p12  ;;  %s404_s22 = scalar_lea.vmem %s403_s13, 256 }
  0x19   : > { %p406_p1 = scmp.lt.s32.totalorder %s404_s22, %s398_s17 }
  0x1b   : > { %p407_p2 = por %p406_p1, %p405_p0 }
  0x1c   : > { %183 = vperm.xlu1 %388, %v169_v5   ;;  %175 = vmax.xlane.f32.xlu0 %v174_v6 }
  0x1d   : > { %p408_p3 = pnand %p407_p2, %p401_p13 }
  0x93   : > { %v181_v14 = vpop.permute.xlu1 %180 }
  0x94   : > { %vm185_vm1 = vcmp.eq.s32.totalorder %v178_v15, %v181_v14 }
  0x95   : > { %v187_v18 = vsel %vm185_vm1, %v166_v1, 0.0 }
  0x96   : > { %v189_v20 = vsel %vm170_vm0, %v187_v18, 0.0 }
  0x97   : > { %v184_v16 = vpop.permute.xlu1 %183 }
  0x98   : > { %vm186_vm2 = vcmp.eq.s32.totalorder %v178_v15, %v184_v16 }
  0x99   : > { %v188_v22 = vsel %vm186_vm2, %v167_v2, 0.0 }
  0x9a   : > { %v192_v24 = vsel %vm170_vm0, %v188_v22, 0.0 }
  0xa1   : > { %v173_v7 = vpop.xlane.xlu0 %172 }
  0xa2   : > { %v201_v8 = vsub.f32 %v166_v1, %v173_v7 }
  0xa4   : > { %v203_v9 = vmul.f32 1.442695, %v201_v8 }
  0xa5   : > { %v176_v10 = vpop.xlane.xlu0 %175 }
  0xa6   : > { %390 = vpow2.f32 %v203_v9  ;;  %v202_v11 = vsub.f32 %v167_v2, %v176_v10 }
  0xa8   : > { %v205_v12 = vmul.f32 1.442695, %v202_v11 }
  0xaa   : > { %392 = vpow2.f32 %v205_v12 }
  0xb3   : > { %v391_v17 = vpop.eup %390 }
  0xb4   : > { %v207_v19 = vsel %vm170_vm0, %v391_v17, 0.0 }
  0xb5   : > { %208 = vadd.xlane.f32.xlu0 %v207_v19 }
  0xb7   : > { %v393_v21 = vpop.eup %392 }
  0xb8   : > { %v210_v23 = vsel %vm170_vm0, %v393_v21, 0.0 }
  0xb9   : > { %190 = vadd.xlane.f32.xlu0 %v189_v20  ;;  %211 = vadd.xlane.f32.xlu1 %v210_v23 }
  0xbd   : > { %193 = vadd.xlane.f32.xlu0 %v192_v24 }
  0xc1   : > { %196 = vadd.xlane.f32.xlu0 %v195_v25 }
  0xc5   : > { %199 = vadd.xlane.f32.xlu0 %v198_v26 }
 0x13e   : > { %v209_v27 = vpop.xlane.xlu0 %208 }
 0x13f   : > { %394 = vlog2.f32 %v209_v27 }
 0x142   : > { %v212_v28 = vpop.xlane.xlu1 %211  ;;  %v191_v29 = vpop.xlane.xlu0 %190 }
 0x143   : > { %396 = vlog2.f32 %v212_v28  ;;  %v217_v37 = vsub.f32 %v191_v29, %v173_v7 }
 0x146   : > { %v194_v30 = vpop.xlane.xlu0 %193 }
 0x147   : > { %v218_v40 = vsub.f32 %v194_v30, %v176_v10 }
 0x14a   : > { %v197_v33 = vpop.xlane.xlu0 %196 }
 0x14c   : > { %v395_v31 = vpop.eup %394 }
 0x14d   : > { %v214_v32 = vmul.f32 0.6931472, %v395_v31 }
 0x14e   : > { %v200_v43 = vpop.xlane.xlu0 %199 }
 0x14f   : > { %v223_v34 = vadd.f32 %v214_v32, %v173_v7  ;;  %v219_v39 = vsub.f32 %v217_v37, %v214_v32 }
 0x150   : > { %v397_v35 = vpop.eup %396 }
 0x151   : > { %v216_v36 = vmul.f32 0.6931472, %v397_v35  ;;  %v225_v38 = vmul.f32 16.0, %v223_v34  ;;  %v221_v47 = vmul.f32 -0.9, %v219_v39 }
 0x153   : > { %v227_v41 = vsub.f32 %v197_v33, %v225_v38  ;;  %v224_v42 = vadd.f32 %v216_v36, %v176_v10  ;;  %v220_v44 = vsub.f32 %v218_v40, %v216_v36 }
 0x155   : > { %v229_v45 = vmul.f32 0.00625, %v227_v41  ;;  %v226_v46 = vmul.f32 16.0, %v224_v42  ;;  %v222_v49 = vmul.f32 -0.9, %v220_v44 }
 0x157   : > { %v228_v48 = vsub.f32 %v200_v43, %v226_v46  ;;  %v231_v50 = vsub.f32 %v221_v47, %v229_v45 }
 0x159   : > { %v230_v51 = vmul.f32 0.00625, %v228_v48  ;;  %v234_v53 = vsel %vm233_vm3, %v231_v50, 0.0 }
 0x15b   : > { %v232_v52 = vsub.f32 %v222_v49, %v230_v51 }
 0x15d   : > { %v235_v54 = vsel %vm233_vm3, %v232_v52, 0.0 }
 0x15e   : > { %v236_v55 = vadd.f32 %v235_v54, %v234_v53 }
 0x160   : > { %237 = vadd.xlane.f32.xlu0 %v236_v55 }
 0x1e9   : > { %v238_v56 = vpop.xlane.xlu0 %237 }
 0x1ea   : > { %v239_v57 = vrot.slane %v238_v56, 4 }
 0x1ec   : > { %v240_v58 = vadd.f32 %v239_v57, %v238_v56 }
 0x1ee   : > { %v241_v59 = vrot.slane %v240_v58, 2 }
 0x1f0   : > { %v242_v60 = vadd.f32 %v241_v59, %v240_v58 }
 0x1f2   : > { %v243_v61 = vrot.slane %v242_v60, 1 }
 0x1f4   : > { %v244_v62 = vadd.f32 %v243_v61, %v242_v60 }
 0x1f6   : > { %346 = vpush %v244_v62 }
 0x227   : > { %s347_s6 = spop %346 }
 0x228   : > { %v246_v63 = vstv %s347_s6 }
 0x229   : > { %247 = vst [vmem:[%s153_s3] sm:$0xff] %v246_v63 }
 0x22a   : > { %411 = shalt.err (!%p408_p3)
}
 0x22b   : > { %s412_s23 = scalar_lea.hbm %s260_s14, 128  ;;  %s416_s26 = scalar_lea.hbm %s582_s2, 256 }
 0x22c   : > { %p413_p4 = scmp.ne.s32.totalorder %s260_s14, %s412_s23  ;;  %p417_p9 = scmp.lt.s32.totalorder %s260_s14, %s582_s2 }
 0x22d   : > { %p418_p10 = scmp.lt.s32.totalorder %s416_s26, %s412_s23 }
 0x22e   : > { %p414_p7 = pnand %p413_p4, %p515_p5 }
 0x22f   : > { %p419_p11 = por %p418_p10, %p417_p9 }
 0x230   : > { %p415_p8 = pneg %p414_p7 }
 0x232   : > { %p420_p12 = pnand %p419_p11, %p415_p8 }
 0x234   : > { %423 = shalt.err (!%p420_p12)
}
 0x235   : > { %348 = dma.vmem_to_hbm [thread:$0]  (%p515_p5), %s542_s4, 128, %s260_s14, %s249_s16  }
 0x236 PF: > { %p354_p13 = scmp.ge.s32.totalorder %s458_s12, 2  ;;  %s274_s29 = sand.u32 1, %s446_s9  }
 0x237   : > { %s275_s30 = scalar_lea.sflag [#allocation3], %s274_s29 }
 0x238   : > { %p351_p0 = pnand %p354_p13, %p519_p6 }
 0x23a   : > { %p352_p1 = pneg %p351_p0 }
 0x23c   : > { %441 = dma.done.wait (%p352_p1), %s275_s30, 128  }
 0x23d   : > { %443 = vsyncadd (%p352_p1), %s275_s30, 4294967168  ;;  %p12_p2 = scmp.ge.s32.totalorder %s502_s15, 4   ;;  %s585_s9 = smov %s450_s10 }
 0x23e   : > { %s586_s10 = smov %s454_s11  ;;  %s587_s11 = smov %s513_s18 }
 0x23f   : > { %s588_s12 = smov %s502_s15  ;;  %14 = sbr.rel (!%p12_p2) target bundleno = 3 (0x3), region = 66 }
 0x244   :  { %280 = vsyncpa [#allocation3], 1 }
 0x245   :  { %282 = vsyncpa [#allocation3 + $0x1], 1 }

</bundles_post_ra>
